<compile_context>
chip_gen: v6e
topology: v6e:2x2x1
jax: 0.10.0
libtpu: 0.0.40
codegen_flags: <defaults>
</compile_context>

<pallas_src>
import math

import jax
import jax.numpy as jnp
from jax.experimental import pallas as pl
from jax.experimental.pallas import tpu as pltpu

_LANE = 128  # TPU lane width


# ---------------------------------------------------------------------------
# Kernels (alpha_ref is either (1, C) or (TM, C); broadcasting covers both).
# ---------------------------------------------------------------------------
def _layer_scale_kernel(x_ref, a_ref, o_ref):
    o_ref[...] = (x_ref[...].astype(a_ref.dtype) * a_ref[...]).astype(o_ref.dtype)


def _residual_layer_scale_kernel(r_ref, x_ref, a_ref, o_ref):
    o_ref[...] = (
        r_ref[...].astype(a_ref.dtype) + x_ref[...].astype(a_ref.dtype) * a_ref[...]
    ).astype(o_ref.dtype)


# ---------------------------------------------------------------------------
# Layout / tiling helpers
# ---------------------------------------------------------------------------
def _sublane_multiple(*dtypes):
    sub = 8
    for dt in dtypes:
        sub = max(sub, 8 * max(1, 4 // jnp.dtype(dt).itemsize))
    return sub


def _plan_layout(n_elems, d):
    """Flatten [B,S,D] to a lane-dense [rows, cols] view.

    Returns (rows, cols, period, lane_reps) where alpha becomes a periodic
    plane of `period` rows of width `cols` (lane_reps = copies of alpha per
    period)."""
    if d % _LANE == 0:
        return n_elems // d, d, 1, 1
    if n_elems % _LANE == 0:
        lcm = (d * _LANE) // math.gcd(d, _LANE)
        return n_elems // _LANE, _LANE, lcm // _LANE, lcm // d
    # TODO(synk): ragged D with n_elems % 128 != 0 keeps cols=D and emits
    # masked (vst.msk) stores on the lane dim; pad externally if this matters.
    return n_elems // d, d, 1, 1


# ---------------------------------------------------------------------------
# Shared wrapper for `x*alpha` and `residual + x*alpha`
# ---------------------------------------------------------------------------
def _scale_add(x, alpha, residual, *, preserve_input_dtype, donate,
               target_block_bytes):
    B, S, D = x.shape
    assert alpha.shape == (D,)
    if residual is not None:
        assert residual.shape == x.shape

    itemsize = lambda dt: jnp.dtype(dt).itemsize

    compute_dtype = jnp.promote_types(x.dtype, alpha.dtype)
    if residual is not None:
        compute_dtype = jnp.promote_types(compute_dtype, residual.dtype)
    out_dtype = x.dtype if preserve_input_dtype else compute_dtype

    n_elems = B * S * D
    rows, cols, period, lane_reps = _plan_layout(n_elems, D)

    x2 = x.reshape(rows, cols)
    res2 = residual.reshape(rows, cols) if residual is not None else None

    if lane_reps > 1:
        alpha_plane = jnp.tile(alpha, lane_reps).reshape(period, cols)
    else:
        alpha_plane = alpha.reshape(period, cols)
    alpha_plane = alpha_plane.astype(compute_dtype)

    dts = (x.dtype, out_dtype) + ((residual.dtype,) if residual is not None else ())
    sub = _sublane_multiple(*dts)
    step = (sub * period) // math.gcd(sub, period)  # lcm(sub, period)

    # Bytes of HBM traffic per flattened row of the block (in + out [+ res]
    # [+ materialised periodic alpha]).
    per_row_bytes = cols * (itemsize(x.dtype) + itemsize(out_dtype))
    if residual is not None:
        per_row_bytes += cols * itemsize(residual.dtype)
    if period > 1:
        per_row_bytes += cols * itemsize(compute_dtype)

    # Tile sizing: ~target_block_bytes of in+out traffic per block (the ~4 MiB
    # pipelining knee), rounded to `step`, but guarantee >= 2 grid steps
    # whenever rows allow so the ("parallel",) axis shards across v7x's 2 TCs.
    tm = max(step, (target_block_bytes // per_row_bytes) // step * step)
    if rows >= 2 * step:
        half = max(step, (rows // (2 * step)) * step)  # <= rows/2, multiple of step
        tm = min(tm, half)
    else:
        tm = rows  # single full-extent block (always a legal block shape)
    tm = min(tm, rows)

    if period > 1:
        # Materialise a (tm, cols) periodic alpha block so the kernel stays a
        # plain broadcast multiply (no in-kernel sublane tiling). tm % period == 0.
        alpha_blk = jnp.tile(alpha_plane, (tm // period, 1))
        a_rows = tm
    else:
        alpha_blk = alpha_plane
        a_rows = 1

    grid = (pl.cdiv(rows, tm),)

    # VMEM budget from actual usage: double-buffered data blocks + resident
    # alpha + slack (well under v7x's 64 MiB per-TC VMEM at defaults).
    blk_bytes = tm * cols * (
        itemsize(x.dtype) + itemsize(out_dtype)
        + (itemsize(residual.dtype) if residual is not None else 0)
    )
    alpha_bytes = a_rows * cols * itemsize(compute_dtype)
    vmem_limit = 2 * blk_bytes + 2 * alpha_bytes + (2 << 20)
    vmem_limit = int(max(4 << 20, min(vmem_limit, 56 << 20)))

    data_spec = pl.BlockSpec((tm, cols), lambda i: (i, 0))
    if residual is not None:
        inputs = [res2, x2]
        in_specs = [data_spec, data_spec]
        kernel = _residual_layer_scale_kernel
    else:
        inputs = [x2]
        in_specs = [data_spec]
        kernel = _layer_scale_kernel
    # alpha: tiny, constant block index -> fetched once and kept resident.
    in_specs.append(pl.BlockSpec((a_rows, cols), lambda i: (0, 0)))
    inputs.append(alpha_blk)

    # Reuse the residual/x HBM buffer when the caller allows it and dtypes match.
    io_aliases = {}
    alias_src_dtype = residual.dtype if residual is not None else x.dtype
    if donate and jnp.dtype(alias_src_dtype) == jnp.dtype(out_dtype):
        io_aliases = {0: 0}

    out2 = pl.pallas_call(
        kernel,
        out_shape=jax.ShapeDtypeStruct((rows, cols), out_dtype),
        grid=grid,
        in_specs=in_specs,
        out_specs=data_spec,
        input_output_aliases=io_aliases,
        compiler_params=pltpu.CompilerParams(
            dimension_semantics=("parallel",),  # shard row tiles across TCs
            vmem_limit_bytes=vmem_limit,
        ),
    )(*inputs)

    return out2.reshape(B, S, D)


# ---------------------------------------------------------------------------
# Public entry points
# ---------------------------------------------------------------------------
def layer_scale(x, alpha, *, preserve_input_dtype=False, donate_input=False,
                target_block_bytes=4 * 1024 * 1024):
    """LayerScale.forward: x * alpha[None, None, :] for x of shape [B, S, D]."""
    return _scale_add(x, alpha, None,
                      preserve_input_dtype=preserve_input_dtype,
                      donate=donate_input,
                      target_block_bytes=target_block_bytes)


def residual_layer_scale(residual, x, alpha, *, preserve_input_dtype=False,
                         donate_residual=False,
                         target_block_bytes=4 * 1024 * 1024):
    """Fused IVT call site: residual + LayerScale(x) == residual + x * alpha."""
    return _scale_add(x, alpha, residual,
                      preserve_input_dtype=preserve_input_dtype,
                      donate=donate_residual,
                      target_block_bytes=target_block_bytes)


# ---------------------------------------------------------------------------
# Tests
# ---------------------------------------------------------------------------
if __name__ == "__main__":
    key = jax.random.PRNGKey(0)
    k1, k2, k3, k4, k5, k6 = jax.random.split(key, 6)

    # --- Test 1: standalone LayerScale, small module-like shape, D=32 exercises
    #             the lane-dense repacking path (f32, PyTorch semantics). ---
    B, S, D = 2, 8, 32
    x = jax.random.normal(k1, (B, S, D), dtype=jnp.float32)
    alpha = 1.0 + 0.01 * jax.random.normal(k2, (D,), dtype=jnp.float32)
    out = jax.block_until_ready(layer_scale(x, alpha))
    ref = x * alpha.reshape(1, 1, D)
    assert out.shape == ref.shape and out.dtype == ref.dtype
    assert jnp.allclose(out, ref, atol=1e-6, rtol=1e-6)

    # --- Test 2: fused residual + scale, bf16 in -> bf16 out (no f32 writeback). ---
    xb = jax.random.normal(k3, (B, S, D), dtype=jnp.float32).astype(jnp.bfloat16)
    rb = jax.random.normal(k4, (B, S, D), dtype=jnp.float32).astype(jnp.bfloat16)
    out2 = jax.block_until_ready(
        residual_layer_scale(rb, xb, alpha, preserve_input_dtype=True))
    ref2 = (rb.astype(jnp.float32)
            + xb.astype(jnp.float32) * alpha.reshape(1, 1, D)).astype(jnp.bfloat16)
    assert out2.dtype == jnp.bfloat16
    assert jnp.allclose(out2.astype(jnp.float32), ref2.astype(jnp.float32),
                        atol=1e-2, rtol=1e-2)

    # --- Test 3: D=128 lane-dense, rows large enough that the >=2-step rule
    #             kicks in (grid >= 2 even at the default 4 MiB budget). ---
    B3, S3, D3 = 2, 128, 128
    x3 = jax.random.normal(k5, (B3, S3, D3), dtype=jnp.float32)
    a3 = 1.0 + 0.01 * jax.random.normal(k2, (D3,), dtype=jnp.float32)
    out3 = jax.block_until_ready(layer_scale(x3, a3))
    ref3 = x3 * a3.reshape(1, 1, D3)
    assert jnp.allclose(out3, ref3, atol=1e-6, rtol=1e-6)

    # --- Test 4: ragged D=96 (not a divisor/multiple of 128) -> periodic alpha
    #             plane, still lane-dense 128-wide stores. ---
    B4, S4, D4 = 2, 8, 96
    x4 = jax.random.normal(k6, (B4, S4, D4), dtype=jnp.float32)
    a4 = 1.0 + 0.01 * jax.random.normal(k2, (D4,), dtype=jnp.float32)
    out4 = jax.block_until_ready(layer_scale(x4, a4))
    ref4 = x4 * a4.reshape(1, 1, D4)
    assert jnp.allclose(out4, ref4, atol=1e-6, rtol=1e-6)

    # --- Test 5: donated residual under jit (input_output_aliases path). ---
    @jax.jit
    def block_tail(target, attn_out, a):
        t = target + 0.0  # intermediate inside the jit -> alias is a true in-place
        return residual_layer_scale(t, attn_out, a,
                                    preserve_input_dtype=True,
                                    donate_residual=True)

    t5 = jax.random.normal(k1, (B, S, D), dtype=jnp.float32)
    y5 = jax.random.normal(k3, (B, S, D), dtype=jnp.float32)
    out5 = jax.block_until_ready(block_tail(t5, y5, alpha))
    ref5 = t5 + y5 * alpha.reshape(1, 1, D)
    assert jnp.allclose(out5, ref5, atol=1e-6, rtol=1e-6)

    print("KERNEL_OK")
</pallas_src>

<mosaic_0001>
module attributes {stable_mosaic.version = 11 : i64} {
  func.func @_layer_scale_kernel(%arg0: i32, %arg1: memref<4x128xf32, #tpu.memory_space<vmem>>, %arg2: memref<1x128xf32, #tpu.memory_space<vmem>>, %arg3: memref<4x128xf32, #tpu.memory_space<vmem>>) attributes {dimension_semantics = [#tpu.dimension_semantics<parallel>], iteration_bounds = array<i64: 1>, scalar_prefetch = 0 : i64, scratch_operands = 0 : i64, tpu.core_type = #tpu.core_type<tc>, window_params = [{transform_indices = @transform_0, window_bounds = array<i64: 4, 128>}, {pipeline_mode = #tpu.pipeline_mode<synchronous>, transform_indices = @transform_1, window_bounds = array<i64: 1, 128>}, {transform_indices = @transform_2, window_bounds = array<i64: 4, 128>}]} {
    %c0 = arith.constant 0 : index
    %c0_0 = arith.constant 0 : index
    %0 = vector.load %arg1[%c0, %c0_0] : memref<4x128xf32, #tpu.memory_space<vmem>>, vector<4x128xf32>
    %c0_1 = arith.constant 0 : index
    %c0_2 = arith.constant 0 : index
    %1 = vector.load %arg2[%c0_1, %c0_2] : memref<1x128xf32, #tpu.memory_space<vmem>>, vector<1x128xf32>
    %2 = vector.broadcast %1 : vector<1x128xf32> to vector<4x128xf32>
    %3 = arith.mulf %0, %2 : vector<4x128xf32>
    %c0_3 = arith.constant 0 : index
    %c0_4 = arith.constant 0 : index
    %4 = vector.load %arg3[%c0_3, %c0_4] : memref<4x128xf32, #tpu.memory_space<vmem>>, vector<4x128xf32>
    tpu.vector_store %arg3[%c0_3, %c0_4], %3 {strides = array<i32>} : memref<4x128xf32, #tpu.memory_space<vmem>>, vector<4x128xf32>,
    return
  }
  func.func @transform_0(%arg0: i32) -> (i32, i32) {
    %c0_i32 = arith.constant 0 : i32
    %c0_i32_0 = arith.constant 0 : i32
    return %arg0, %c0_i32 : i32, i32
  }
  func.func @transform_1(%arg0: i32) -> (i32, i32) {
    %c0_i32 = arith.constant 0 : i32
    %c0_i32_0 = arith.constant 0 : i32
    %c0_i32_1 = arith.constant 0 : i32
    return %c0_i32, %c0_i32_0 : i32, i32
  }
  func.func @transform_2(%arg0: i32) -> (i32, i32) {
    %c0_i32 = arith.constant 0 : i32
    %c0_i32_0 = arith.constant 0 : i32
    return %arg0, %c0_i32 : i32, i32
  }
}

</mosaic_0001>

<bundles_post_ra>
// kernel: tpu_custom_call.1
= control target key start
LH: loop header
LB: loop body
LE: loop exit
PB: predicated region body
PF: predicated region fallthrough
CT: control target
= control target key end

     0   :  { %7 = vsyncpa [#allocation3], 0  ;;  %s122_s0 = inlined_call_operand.hbm [shape: f32[4,128], index: 0, kind: input, shape index: {}]   ;;  %s123_s1 = inlined_call_operand.vmem [shape: f32[1,128], index: 1, kind: input, shape index: {}]   ;;  %s124_s2 = inlined_call_operand.hbm [shape: f32[4,128], index: 2, kind: output, shape index: {}]  }
   0x1   :  { %8 = vsyncpa [#allocation4], 0  ;;  %s96_s9 = smov [#allocation2]  }
   0x2   :  { %s15_s10 = sshll.u32 %s96_s9, 4  ;;  %s16_s10 = int_to_ptr.vmem [resolvable:$true] %s15_s10 }
   0x3   :  { %s60_s11 = scalar_lea.vmem %s16_s10, 64  ;;  %p65_p1 = scmp.lt.s32.totalorder %s16_s10, %s16_s10 }
   0x4   :  { %p61_p0 = scmp.ne.s32.totalorder %s16_s10, %s60_s11  ;;  %p66_p2 = scmp.lt.s32.totalorder %s60_s11, %s60_s11 }
   0x6   :  { %p67_p3 = por %p66_p2, %p65_p1 }
   0x8   :  { %p68_p4 = pnand %p67_p3, %p61_p0 }
   0xa   :  { %71 = shalt.err (!%p68_p4)
}
   0xb   :  { %18 = dma.hbm_to_vmem [thread:$0]  %s122_s0, 64, %s16_s10, [#allocation3]  }
   0xc   :  { %92 = dma.done.wait [#allocation3], 64  }
   0xd   :  { %93 = vsyncadd [#allocation3], 4294967232  ;;  %s97_s14 = smov [#allocation5]   ;;  %v24_v0 = vld [vmem:[#allocation2] sm:$0xf] }
   0xe   :  { %s40_s15 = sshll.u32 %s97_s14, 4  ;;  %v49_v1 = vld [vmem:[%s123_s1] ss:$0 sm:$0xff]  ;;  %s41_s15 = int_to_ptr.vmem [resolvable:$true] %s40_s15 }
   0xf   :  { %v32_v2 = vmul.f32 %v49_v1, %v24_v0  ;;  %s72_s18 = scalar_lea.vmem %s41_s15, 64  ;;  %p77_p6 = scmp.lt.s32.totalorder %s41_s15, %s41_s15 }
  0x10   :  { %p73_p5 = scmp.ne.s32.totalorder %s41_s15, %s72_s18  ;;  %p78_p7 = scmp.lt.s32.totalorder %s72_s18, %s72_s18 }
  0x11   :  { %33 = vst [vmem:[#allocation5] sm:$0xf] %v32_v2 }
  0x12   :  { %p79_p8 = por %p78_p7, %p77_p6 }
  0x14   :  { %p80_p9 = pnand %p79_p8, %p73_p5 }
  0x16   :  { %83 = shalt.err (!%p80_p9)
}
  0x17   :  { %43 = dma.vmem_to_hbm [thread:$0]  %s41_s15, 64, %s124_s2, [#allocation4]  }
  0x18   :  { %94 = dma.done.wait [#allocation4], 64  }
  0x19   :  { %95 = vsyncadd [#allocation4], 4294967232 }
  0x1a   :  { %47 = vsyncpa [#allocation3], 1 }
  0x1b   :  { %48 = vsyncpa [#allocation4], 1 }

</bundles_post_ra>
